<compile_context>
chip_gen: v5e
topology: v5e:2x2
jax: 0.10.0
libtpu: 0.0.40
codegen_flags: <defaults>
</compile_context>

<pallas_src>
import numpy as np
import jax
import jax.numpy as jnp
from jax import lax
from jax.experimental import pallas as pl
from jax.experimental.pallas import tpu as pltpu

# ---------------- configuration (embedding shapes chosen by this synthetic module) ---
NUM_LANDMARKS = 67
NUM_THETAS = 48
D_LM = 32          # landmark embedding dim
D_TH = 32          # theta embedding dim
D_OUT = D_LM + D_TH

K_PAD = 128                  # per-table contraction pad (MXU-friendly)
K_TOTAL = 2 * K_PAD          # combined one-hot width (landmark block + theta block)
DEFAULT_BLOCK_B = 256        # batch rows per grid step


def _round_up(x, m):
    return ((x + m - 1) // m) * m


def _gather_concat_kernel(lm_ids_ref, th_ids_ref, table_ref, out_ref):
    """lm_ids_ref, th_ids_ref: (block_B, 1) int32 in VMEM
       table_ref:              (K_TOTAL, D_OUT) f32 in VMEM (resident across grid)
       out_ref:                (block_B, D_OUT) f32
    """
    block_b = out_ref.shape[0]
    # Combined one-hot: column lm_id selects the landmark row, column
    # (K_PAD + th_id) selects the theta row of the packed table.
    iota = lax.broadcasted_iota(jnp.int32, (block_b, K_TOTAL), dimension=1)
    lm = lm_ids_ref[...]                    # (block_B, 1)
    th = th_ids_ref[...] + K_PAD            # (block_B, 1)
    onehot = jnp.logical_or(iota == lm, iota == th).astype(jnp.float32)
    # Single MXU pass produces the concatenated [landmark_emb | theta_emb] rows.
    out_ref[...] = jnp.dot(onehot, table_ref[...],
                           preferred_element_type=jnp.float32)


def symbolic_instruction_forward(landmark_table, theta_table, landmark_ids,
                                 theta1_ids, *, block_b=DEFAULT_BLOCK_B):
    """landmark_table: [NUM_LANDMARKS, D_LM] f32
       theta_table:    [NUM_THETAS,   D_TH] f32
       landmark_ids, theta1_ids: [B] int32
       returns:        [B, D_LM + D_TH] f32
    """
    B = landmark_ids.shape[0]
    num_lm, d_lm = landmark_table.shape
    num_th, d_th = theta_table.shape
    d_out = d_lm + d_th

    # ---- pack both tables into one lane-dense VMEM-resident table -------------
    table = jnp.zeros((K_TOTAL, d_out), jnp.float32)
    table = table.at[:num_lm, :d_lm].set(landmark_table.astype(jnp.float32))
    table = table.at[K_PAD:K_PAD + num_th, d_lm:].set(theta_table.astype(jnp.float32))

    # ---- pad the batch to sublane-dense chunks --------------------------------
    blk = min(block_b, _round_up(B, 8))          # multiple of 8
    b_pad = _round_up(B, blk)
    lm_ids = jnp.zeros((b_pad, 1), jnp.int32).at[:B, 0].set(
        landmark_ids.astype(jnp.int32))
    th_ids = jnp.zeros((b_pad, 1), jnp.int32).at[:B, 0].set(
        theta1_ids.astype(jnp.int32))

    grid = (b_pad // blk,)

    out = pl.pallas_call(
        _gather_concat_kernel,
        out_shape=jax.ShapeDtypeStruct((b_pad, d_out), jnp.float32),
        grid=grid,
        in_specs=[
            pl.BlockSpec((blk, 1), lambda i: (i, 0)),          # landmark ids chunk
            pl.BlockSpec((blk, 1), lambda i: (i, 0)),          # theta ids chunk
            pl.BlockSpec((K_TOTAL, d_out), lambda i: (0, 0)),  # resident table
        ],
        out_specs=pl.BlockSpec((blk, d_out), lambda i: (i, 0)),
        compiler_params=pltpu.CompilerParams(
            dimension_semantics=("parallel",),   # v7x: shard chunks across 2 TCs
        ),
    )(lm_ids, th_ids, table)

    return out[:B]


def reference_forward(landmark_table, theta_table, landmark_ids, theta1_ids):
    return jnp.concatenate(
        [landmark_table[landmark_ids], theta_table[theta1_ids]], axis=1
    )


if __name__ == "__main__":
    key = jax.random.PRNGKey(0)
    k_lm, k_th, k_rad, k_ids = jax.random.split(key, 4)

    # Deterministic parameter init (mimics nn.Embedding weight tables).
    landmark_table = jax.random.normal(k_lm, (NUM_LANDMARKS, D_LM), dtype=jnp.float32)
    theta_table = jax.random.normal(k_th, (NUM_THETAS, D_TH), dtype=jnp.float32)
    # radius_embedding exists in __init__ but is unused by forward; kept for parity.
    radius_table = jax.random.normal(k_rad, (16, D_TH), dtype=jnp.float32)  # unused

    # Example symbolic_instructions_batch: list of (landmark_i, theta_1, theta_2, r)
    B = 8
    rng = np.random.default_rng(0)
    symbolic_instructions_batch = [
        (int(rng.integers(0, NUM_LANDMARKS)),
         int(rng.integers(0, NUM_THETAS)),
         int(rng.integers(0, NUM_THETAS)),   # theta_2 (unused in forward)
         int(rng.integers(0, 16)))           # r       (unused in forward)
        for _ in range(B)
    ]

    landmark_ids = jnp.asarray(
        [inst[0] for inst in symbolic_instructions_batch], dtype=jnp.int32)
    theta1_ids = jnp.asarray(
        [inst[1] for inst in symbolic_instructions_batch], dtype=jnp.int32)

    out = symbolic_instruction_forward(
        landmark_table, theta_table, landmark_ids, theta1_ids)
    out = jax.block_until_ready(out)

    ref = reference_forward(landmark_table, theta_table, landmark_ids, theta1_ids)
    np.testing.assert_allclose(np.asarray(out), np.asarray(ref), rtol=1e-6, atol=1e-6)

    print("KERNEL_OK")
</pallas_src>

<mosaic_0001>
module attributes {stable_mosaic.version = 11 : i64} {
  func.func @_gather_concat_kernel(%arg0: i32, %arg1: memref<8x1xi32, #tpu.memory_space<vmem>>, %arg2: memref<8x1xi32, #tpu.memory_space<vmem>>, %arg3: memref<256x64xf32, #tpu.memory_space<vmem>>, %arg4: memref<8x64xf32, #tpu.memory_space<vmem>>) attributes {dimension_semantics = [#tpu.dimension_semantics<parallel>], iteration_bounds = array<i64: 1>, scalar_prefetch = 0 : i64, scratch_operands = 0 : i64, tpu.core_type = #tpu.core_type<tc>, window_params = [{transform_indices = @transform_0, window_bounds = array<i64: 8, 1>}, {transform_indices = @transform_1, window_bounds = array<i64: 8, 1>}, {pipeline_mode = #tpu.pipeline_mode<synchronous>, transform_indices = @transform_2, window_bounds = array<i64: 256, 64>}, {transform_indices = @transform_3, window_bounds = array<i64: 8, 64>}]} {
    %0 = tpu.iota {dimensions = array<i32: 1>} : vector<8x256xi32>
    %c0 = arith.constant 0 : index
    %c0_0 = arith.constant 0 : index
    %1 = vector.load %arg1[%c0, %c0_0] : memref<8x1xi32, #tpu.memory_space<vmem>>, vector<8x1xi32>
    %c0_1 = arith.constant 0 : index
    %c0_2 = arith.constant 0 : index
    %2 = vector.load %arg2[%c0_1, %c0_2] : memref<8x1xi32, #tpu.memory_space<vmem>>, vector<8x1xi32>
    %c128_i32 = arith.constant 128 : i32
    %3 = vector.broadcast %c128_i32 : i32 to vector<8x1xi32>
    %4 = arith.addi %2, %3 : vector<8x1xi32>
    %5 = vector.broadcast %1 : vector<8x1xi32> to vector<8x256xi32>
    %6 = arith.cmpi eq, %0, %5 : vector<8x256xi32>
    %7 = vector.broadcast %4 : vector<8x1xi32> to vector<8x256xi32>
    %8 = arith.cmpi eq, %0, %7 : vector<8x256xi32>
    %9 = arith.ori %6, %8 : vector<8x256xi1>
    %10 = arith.extui %9 : vector<8x256xi1> to vector<8x256xi32>
    %11 = arith.sitofp %10 : vector<8x256xi32> to vector<8x256xf32>
    %c0_3 = arith.constant 0 : index
    %c0_4 = arith.constant 0 : index
    %12 = vector.load %arg3[%c0_3, %c0_4] : memref<256x64xf32, #tpu.memory_space<vmem>>, vector<256x64xf32>
    %cst = arith.constant dense<0.000000e+00> : vector<8x64xf32>
    %13 = tpu.matmul %11, %12, %cst {dimension_numbers = #tpu.dot_dimension_numbers<[1], [0], [0], [1], [0, 0, 1, 1], [], []>} : vector<8x256xf32>, vector<256x64xf32>, vector<8x64xf32> -> vector<8x64xf32>
    %c0_5 = arith.constant 0 : index
    %c0_6 = arith.constant 0 : index
    %14 = vector.load %arg4[%c0_5, %c0_6] : memref<8x64xf32, #tpu.memory_space<vmem>>, vector<8x64xf32>
    tpu.vector_store %arg4[%c0_5, %c0_6], %13 {strides = array<i32>} : memref<8x64xf32, #tpu.memory_space<vmem>>, vector<8x64xf32>,
    return
  }
  func.func @transform_0(%arg0: i32) -> (i32, i32) {
    %c0_i32 = arith.constant 0 : i32
    %c0_i32_0 = arith.constant 0 : i32
    return %arg0, %c0_i32 : i32, i32
  }
  func.func @transform_1(%arg0: i32) -> (i32, i32) {
    %c0_i32 = arith.constant 0 : i32
    %c0_i32_0 = arith.constant 0 : i32
    return %arg0, %c0_i32 : i32, i32
  }
  func.func @transform_2(%arg0: i32) -> (i32, i32) {
    %c0_i32 = arith.constant 0 : i32
    %c0_i32_0 = arith.constant 0 : i32
    %c0_i32_1 = arith.constant 0 : i32
    return %c0_i32, %c0_i32_0 : i32, i32
  }
  func.func @transform_3(%arg0: i32) -> (i32, i32) {
    %c0_i32 = arith.constant 0 : i32
    %c0_i32_0 = arith.constant 0 : i32
    return %arg0, %c0_i32 : i32, i32
  }
}

</mosaic_0001>

<bundles_post_ra>
// kernel: tpu_custom_call.1
= control target key start
LH: loop header
LB: loop body
LE: loop exit
PB: predicated region body
PF: predicated region fallthrough
CT: control target
= control target key end

     0   :  { %v161_v2 = vmov 0   ;;  %s289_s0 = inlined_call_operand.vmem [shape: s32[8,1], index: 0, kind: input, shape index: {}]   ;;  %s290_s1 = inlined_call_operand.vmem [shape: s32[8,1], index: 1, kind: input, shape index: {}]   ;;  %s291_s2 = inlined_call_operand.vmem [shape: f32[256,64], index: 2, kind: input, shape index: {}]   ;;  %s292_s3 = inlined_call_operand.hbm [shape: f32[8,64], index: 3, kind: output, shape index: {}]  }
   0x1   :  { %v18_v0 = vld [vmem:[%s289_s0] sm:$0xff]  ;;  %v52_v1 = vld [vmem:[%s291_s2 + $0x78] sm:$0xff]  ;;  %134 = vset.pattern.permute.xlu0 %v161_v2  ;;  %v51_v4 = vld [vmem:[%s291_s2 + $0x70] sm:$0xff] }
   0x2   :  { %69 = vmatpush.msra.mxu0 %v52_v1  ;;  %v68_v3 = vld [vmem:[%s291_s2 + $0xf8] sm:$0xff]  ;;  %v67_v5 = vld [vmem:[%s291_s2 + $0xf0] sm:$0xff]  ;;  %22 = vperm.xlu0 %134, %v18_v0   ;;  %v50_v6 = vld [vmem:[%s291_s2 + $0x68] sm:$0xff] }
   0x3   :  { %89 = vmatpush.msra.mxu1 %v68_v3  ;;  %v19_v7 = vld [vmem:[%s290_s1] sm:$0xff]  ;;  %v66_v8 = vld [vmem:[%s291_s2 + $0xe8] sm:$0xff]  ;;  %v48_v12 = vld [vmem:[%s291_s2 + $0x58] sm:$0xff] }
   0x4   :  { %70 = vmatpush.msra.mxu0 %v51_v4  ;;  %v49_v9 = vld [vmem:[%s291_s2 + $0x60] sm:$0xff]  ;;  %v20_v11 = vadd.s32 128, %v19_v7  ;;  %v64_v13 = vld [vmem:[%s291_s2 + $0xd8] sm:$0xff]  ;;  %v47_v14 = vld [vmem:[%s291_s2 + $0x50] sm:$0xff] }
   0x5   :  { %90 = vmatpush.msra.mxu1 %v67_v5  ;;  %v65_v10 = vld [vmem:[%s291_s2 + $0xe0] sm:$0xff] }
   0x6   :  { %71 = vmatpush.msra.mxu0 %v50_v6 }
   0x7   :  { %91 = vmatpush.msra.mxu1 %v66_v8 }
   0x8   :  { %72 = vmatpush.msra.mxu0 %v49_v9 }
   0x9   :  { %92 = vmatpush.msra.mxu1 %v65_v10 }
   0xa   :  { %8 = vsyncpa [#allocation3], 0  ;;  %73 = vmatpush.msra.mxu0 %v48_v12  ;;  %v63_v15 = vld [vmem:[%s291_s2 + $0xd0] sm:$0xff]  ;;  %27 = vperm.xlu0 %134, %v20_v11   ;;  %v46_v16 = vld [vmem:[%s291_s2 + $0x48] sm:$0xff]  ;;  %v15_v36 = vlaneseq  ;;  %v162_v41 = vmov 1.0   ;;  %s163_s0 = smov [#allocation2]  }
   0xb   :  { %93 = vmatpush.msra.mxu1 %v64_v13  ;;  %v62_v17 = vld [vmem:[%s291_s2 + $0xc8] sm:$0xff]  ;;  %v45_v18 = vld [vmem:[%s291_s2 + $0x40] sm:$0xff]  ;;  %v44_v20 = vld [vmem:[%s291_s2 + $0x38] sm:$0xff]  ;;  %s116_s22 = sshll.u32 %s163_s0, 4  ;;  %s118_s24 = sshll.u32 %s292_s3, 4  ;;  %vm109_vm6 = vcmask 523264   ;;  %s117_s22 = int_to_ptr.vmem [resolvable:$true] %s116_s22  ;;  %s119_s24 = int_to_ptr.hbm [resolvable:$true] %s118_s24 }
   0xc   :  { %74 = vmatpush.msra.mxu0 %v47_v14  ;;  %v61_v19 = vld [vmem:[%s291_s2 + $0xc0] sm:$0xff]  ;;  %v60_v21 = vld [vmem:[%s291_s2 + $0xb8] sm:$0xff]  ;;  %v43_v22 = vld [vmem:[%s291_s2 + $0x30] sm:$0xff]  ;;  %v16_v38 = vand.u32 127, %v15_v36 }
   0xd   :  { %94 = vmatpush.msra.mxu1 %v63_v15  ;;  %v59_v23 = vld [vmem:[%s291_s2 + $0xb0] sm:$0xff]  ;;  %v42_v24 = vld [vmem:[%s291_s2 + $0x28] sm:$0xff]  ;;  %v41_v26 = vld [vmem:[%s291_s2 + $0x20] sm:$0xff] }
   0xe   :  { %75 = vmatpush.msra.mxu0 %v46_v16  ;;  %v58_v25 = vld [vmem:[%s291_s2 + $0xa8] sm:$0xff]  ;;  %v57_v27 = vld [vmem:[%s291_s2 + $0xa0] sm:$0xff]  ;;  %v40_v28 = vld [vmem:[%s291_s2 + $0x18] sm:$0xff]  ;;  %v17_v39 = vadd.s32 128, %v16_v38 }
   0xf   :  { %95 = vmatpush.msra.mxu1 %v62_v17  ;;  %v56_v29 = vld [vmem:[%s291_s2 + $0x98] sm:$0xff]  ;;  %v39_v30 = vld [vmem:[%s291_s2 + $0x10] sm:$0xff]  ;;  %v38_v32 = vld [vmem:[%s291_s2 + $0x8] sm:$0xff] }
  0x10   :  { %76 = vmatpush.msra.mxu0 %v45_v18  ;;  %v55_v31 = vld [vmem:[%s291_s2 + $0x90] sm:$0xff]  ;;  %v54_v33 = vld [vmem:[%s291_s2 + $0x88] sm:$0xff]  ;;  %v37_v34 = vld [vmem:[%s291_s2] sm:$0xff] }
  0x11   :  { %96 = vmatpush.msra.mxu1 %v61_v19  ;;  %v53_v35 = vld [vmem:[%s291_s2 + $0x80] sm:$0xff] }
  0x12   :  { %77 = vmatpush.msra.mxu0 %v44_v20 }
  0x13   :  { %97 = vmatpush.msra.mxu1 %v60_v21 }
  0x14   :  { %78 = vmatpush.msra.mxu0 %v43_v22 }
  0x15   :  { %98 = vmatpush.msra.mxu1 %v59_v23 }
  0x16   :  { %79 = vmatpush.msra.mxu0 %v42_v24 }
  0x17   :  { %99 = vmatpush.msra.mxu1 %v58_v25 }
  0x18   :  { %80 = vmatpush.msra.mxu0 %v41_v26 }
  0x19   :  { %100 = vmatpush.msra.mxu1 %v57_v27 }
  0x1a   :  { %81 = vmatpush.msra.mxu0 %v40_v28 }
  0x1b   :  { %101 = vmatpush.msra.mxu1 %v56_v29 }
  0x1c   :  { %82 = vmatpush.msra.mxu0 %v39_v30 }
  0x1d   :  { %102 = vmatpush.msra.mxu1 %v55_v31 }
  0x1e   :  { %83 = vmatpush.msra.mxu0 %v38_v32 }
  0x1f   :  { %103 = vmatpush.msra.mxu1 %v54_v33 }
  0x20   :  { %84 = vmatpush.msra.mxu0 %v37_v34 }
  0x21   :  { %104 = vmatpush.msra.mxu1 %v53_v35 }
  0x74   :  { %v23_v37 = vpop.permute.xlu0 %22 }
  0x75   :  { %vm24_vm0 = vcmp.eq.s32.totalorder %v16_v38, %v23_v37  ;;  %vm25_vm3 = vcmp.eq.s32.totalorder %v17_v39, %v23_v37 }
  0x7c   :  { %v28_v40 = vpop.permute.xlu0 %27 }
  0x7d   :  { %vm29_vm1 = vcmp.eq.s32.totalorder %v16_v38, %v28_v40  ;;  %vm30_vm2 = vcmp.eq.s32.totalorder %v17_v39, %v28_v40 }
  0x7e   :  { %vm31_vm4 = vmor %vm24_vm0, %vm29_vm1 }
  0x7f   :  { %vm32_vm5 = vmor %vm25_vm3, %vm30_vm2  ;;  %129 = vmatmul.msk.f32.vlgmr.msra.gmra.mxu0 %vm31_vm4, %v162_v41 }
  0x80   :  { %130 = vmatmul.msk.f32.vlgmr.msra.gmra.mxu1 %vm32_vm5, %v162_v41 }
  0xfc   :  { %v86_v42 = vpop.f32.mrf.mxu0 }
  0xfd   :  { %v106_v43 = vpop.f32.mrf.mxu1 }
  0xfe   :  { %v107_v44 = vadd.f32 %v106_v43, %v86_v42 }
 0x100   :  { %110 = vst.msk [vmem:[#allocation2] sm:$0xff] %vm109_vm6, %v107_v44 }
 0x101   :  { %121 = dma.vmem_to_hbm [thread:$0]  %s117_s22, 128, %s119_s24, [#allocation3]  }
 0x102   :  { %159 = dma.done.wait [#allocation3], 128  }
 0x103   :  { %160 = vsyncadd [#allocation3], 4294967168 }
 0x104   :  { %126 = vsyncpa [#allocation3], 1 }

</bundles_post_ra>
